<compile_context>
chip_gen: v5e
topology: v5e:2x2
jax: 0.10.0
libtpu: 0.0.40
codegen_flags: <defaults>
</compile_context>

<pallas_src>
import functools

import jax
import jax.numpy as jnp
from jax import lax
from jax.experimental import pallas as pl
from jax.experimental.pallas import tpu as pltpu

INPUT_CHANNEL = 1
MIDDLE_CHANNEL = 16
BN_EPS = 1e-5


def _fmap_att_kernel(w1_ref, b1_ref, w2a_ref, w2g_ref, b2_ref,
                     facc_ref, fgyr_ref,
                     oa_ref, og_ref, atta_ref, attg_ref,
                     *, width):
    # facc_ref / fgyr_ref: (1, C, T) blocks, T = tile_h * width (lane-dense).
    # w1_ref (16,6), b1_ref (16,1), w2a_ref/w2g_ref (16,3) in VMEM; b2_ref (2,) in SMEM.
    f_acc = facc_ref[0]                                   # (C, T), native dtype
    f_gyr = fgyr_ref[0]
    c = f_acc.shape[0]

    # channel-mean squeeze, accumulated in f32 (sublane reduction)
    inv_c = jnp.float32(1.0 / c)
    s_acc = jnp.sum(f_acc.astype(jnp.float32), axis=0, keepdims=True) * inv_c   # (1, T)
    s_gyr = jnp.sum(f_gyr.astype(jnp.float32), axis=0, keepdims=True) * inv_c

    T = s_acc.shape[-1]
    lane = lax.broadcasted_iota(jnp.int32, (1, T), 1)
    not_first = (lane % width) != 0                       # W-row boundary masks (hoisted)
    not_last = (lane % width) != (width - 1)

    def tap_prev(x):                                      # out[j] = x[j-1], 0 at row start
        return jnp.where(not_first, pltpu.roll(x, shift=1, axis=1), 0.0)

    def tap_next(x):                                      # out[j] = x[j+1], 0 at row end
        return jnp.where(not_last, pltpu.roll(x, shift=T - 1, axis=1), 0.0)

    # six 1-sublane taps (XLU rolls kept on (1,T) rows only, then broadcast)
    taps = (tap_prev(s_acc), s_acc, tap_next(s_acc),
            tap_prev(s_gyr), s_gyr, tap_next(s_gyr))

    # conv_combination1 (BN folded) for all middle channels at once -> (16, T), then ReLU
    w1 = w1_ref[...]                                      # (16, 6) f32
    b1 = b1_ref[...]                                      # (16, 1) f32
    e_all = b1 + w1[:, 0:1] * taps[0]
    for k in range(1, 6):
        e_all = e_all + w1[:, k:k + 1] * taps[k]
    e_all = jnp.maximum(e_all, 0.0)                       # (16, T)

    # second convs: per-tap sums over the 16 channels (sublane reductions), shifts hoisted
    w2a = w2a_ref[...]                                    # (16, 3)
    w2g = w2g_ref[...]
    sa = [jnp.sum(w2a[:, k:k + 1] * e_all, axis=0, keepdims=True) for k in range(3)]
    sg = [jnp.sum(w2g[:, k:k + 1] * e_all, axis=0, keepdims=True) for k in range(3)]

    acc_logit = b2_ref[0] + tap_prev(sa[0]) + sa[1] + tap_next(sa[2])
    gyr_logit = b2_ref[1] + tap_prev(sg[0]) + sg[1] + tap_next(sg[2])

    att_a = jax.nn.sigmoid(acc_logit)                     # (1, T) f32
    att_g = jax.nn.sigmoid(gyr_logit)

    atta_ref[0] = att_a.astype(atta_ref.dtype)
    attg_ref[0] = att_g.astype(attg_ref.dtype)
    oa_ref[0] = (f_acc.astype(jnp.float32) * att_a).astype(oa_ref.dtype)
    og_ref[0] = (f_gyr.astype(jnp.float32) * att_g).astype(og_ref.dtype)


def _slab_budget_bytes():
    """Per-(C, tile_h*W) slab budget + vmem limit, generation-aware."""
    try:
        cap = pltpu.get_tpu_info().vmem_capacity_bytes
    except Exception:
        cap = 64 << 20                                    # conservative: v7x per-TC VMEM
    vmem_limit = min(cap // 2, 64 << 20)
    # 2 inputs + 2 big outputs, double-buffered ~= 8 live slabs, plus att buffers and
    # in-kernel temporaries -> keep one slab under ~1/10 of 3/4 of the scoped limit.
    slab = ((vmem_limit * 3) // 4) // 10
    return min(slab, 4 << 20), vmem_limit


def _pick_tile_h(c, h, w, itemsize, budget_bytes, want_split):
    """Largest legal tile_h whose (c, tile_h*w) slab fits the budget.

    Legal block shapes need the lane extent tile_h*w to be a multiple of 128, or tile_h == h
    (full array).  If want_split (b == 1), prefer a proper split so both v7x TCs get work.
    """
    def slab(th):
        return c * th * w * itemsize

    dense = [d for d in range(1, h) if h % d == 0 and (d * w) % 128 == 0]
    if want_split and dense:
        cands = dense
    else:
        cands = dense + [h]
    for th in sorted(cands, reverse=True):
        if slab(th) <= budget_bytes:
            return th
    # TODO(synk): pad H (masked tail tile) so a bounded tile always exists for awkward H;
    # for now fall back to the smallest legal tile to minimize VMEM pressure.
    return min(dense) if dense else h


def feature_map_att(f_acc, f_gyr, params):
    b, c, h, w = f_acc.shape
    hw = h * w
    dt = f_acc.dtype
    # Contiguous reshape only (no transpose, no dtype cast -> no extra HBM passes).
    facc2 = f_acc.reshape(b, c, hw)
    fgyr2 = f_gyr.reshape(b, c, hw)

    slab_budget, vmem_limit = _slab_budget_bytes()
    tile_h = _pick_tile_h(c, h, w, dt.itemsize, slab_budget, want_split=(b == 1))
    n_t = h // tile_h
    T = tile_h * w

    vmem = pl.BlockSpec(memory_space=pltpu.MemorySpace.VMEM)
    smem = pl.BlockSpec(memory_space=pltpu.MemorySpace.SMEM)
    big = pl.BlockSpec((1, c, T), lambda bi, ti: (bi, 0, ti))
    att = pl.BlockSpec((1, 1, T), lambda bi, ti: (bi, 0, ti))

    out_shape = (
        jax.ShapeDtypeStruct((b, c, hw), dt),             # f_acc * acc_out
        jax.ShapeDtypeStruct((b, c, hw), dt),             # f_gyr * gyr_out
        jax.ShapeDtypeStruct((b, 1, hw), dt),             # acc_out
        jax.ShapeDtypeStruct((b, 1, hw), dt),             # gyr_out
    )

    kernel = functools.partial(_fmap_att_kernel, width=w)

    oa, og, atta, attg = pl.pallas_call(
        kernel,
        grid=(b, n_t),
        in_specs=[vmem, vmem, vmem, vmem, smem, big, big],
        out_specs=(big, big, att, att),
        out_shape=out_shape,
        compiler_params=pltpu.CompilerParams(
            dimension_semantics=("parallel", "parallel"),
            vmem_limit_bytes=vmem_limit),
    )(params["w1"], params["b1"].reshape(MIDDLE_CHANNEL, 1),
      params["w2a"], params["w2g"], params["b2"],
      facc2, fgyr2)

    return (oa.reshape(b, c, h, w), og.reshape(b, c, h, w),
            atta.reshape(b, 1, h, w), attg.reshape(b, 1, h, w))


def init_params(key):
    """Deterministic synthetic parameters; BN (eval mode, PyTorch defaults) folded into conv."""
    ks = jax.random.split(key, 6)
    conv1_w = 0.3 * jax.random.normal(ks[0], (MIDDLE_CHANNEL, 2 * INPUT_CHANNEL, 1, 3), jnp.float32)
    conv1_b = 0.1 * jax.random.normal(ks[1], (MIDDLE_CHANNEL,), jnp.float32)
    conva_w = 0.3 * jax.random.normal(ks[2], (INPUT_CHANNEL, MIDDLE_CHANNEL, 1, 3), jnp.float32)
    conva_b = 0.1 * jax.random.normal(ks[3], (INPUT_CHANNEL,), jnp.float32)
    convg_w = 0.3 * jax.random.normal(ks[4], (INPUT_CHANNEL, MIDDLE_CHANNEL, 1, 3), jnp.float32)
    convg_b = 0.1 * jax.random.normal(ks[5], (INPUT_CHANNEL,), jnp.float32)

    def fold(wgt, bias, gamma, beta, mean, var):
        scale = gamma / jnp.sqrt(var + BN_EPS)
        return wgt * scale[:, None, None, None], (bias - mean) * scale + beta

    g1 = jnp.ones((MIDDLE_CHANNEL,)); z1 = jnp.zeros((MIDDLE_CHANNEL,))
    w1f, b1f = fold(conv1_w, conv1_b, g1, z1, z1, g1)

    g2 = jnp.ones((INPUT_CHANNEL,)); z2 = jnp.zeros((INPUT_CHANNEL,))
    waf, baf = fold(conva_w, conva_b, g2, z2, z2, g2)
    wgf, bgf = fold(convg_w, convg_b, g2, z2, z2, g2)

    return {
        "w1": w1f[:, :, 0, :].reshape(MIDDLE_CHANNEL, 6),   # (16, in*3): [acc k0..2, gyr k0..2]
        "b1": b1f,                                          # (16,)
        "w2a": waf[0, :, 0, :],                             # (16, 3)
        "w2g": wgf[0, :, 0, :],                             # (16, 3)
        "b2": jnp.array([baf[0], bgf[0]], jnp.float32),     # (2,)
    }


# ---------------- pure-JAX reference (for verification) ----------------
def _conv1x3_nchw(x, wgt, bias):
    y = lax.conv_general_dilated(x, wgt, window_strides=(1, 1),
                                 padding=((0, 0), (1, 1)),
                                 dimension_numbers=("NCHW", "OIHW", "NCHW"))
    return y + bias[None, :, None, None]


def reference(f_acc, f_gyr, params):
    squeeze = jnp.concatenate([jnp.mean(f_acc, 1, keepdims=True),
                               jnp.mean(f_gyr, 1, keepdims=True)], axis=1)
    w1 = params["w1"].reshape(MIDDLE_CHANNEL, 2, 1, 3)
    e = jax.nn.relu(_conv1x3_nchw(squeeze, w1, params["b1"]))
    wa = params["w2a"][None, :, None, :]
    wg = params["w2g"][None, :, None, :]
    a = jax.nn.sigmoid(_conv1x3_nchw(e, wa, params["b2"][0:1]))
    g = jax.nn.sigmoid(_conv1x3_nchw(e, wg, params["b2"][1:2]))
    return f_acc * a, f_gyr * g, a, g


if __name__ == "__main__":
    key = jax.random.PRNGKey(0)
    kx, ky, kp = jax.random.split(key, 3)
    b, c, h, w = 2, 4, 16, 16
    f_acc = jax.random.normal(kx, (b, c, h, w), jnp.float32)
    f_gyr = jax.random.normal(ky, (b, c, h, w), jnp.float32)
    params = init_params(kp)

    outs = jax.block_until_ready(feature_map_att(f_acc, f_gyr, params))
    refs = reference(f_acc, f_gyr, params)

    for o, r in zip(outs, refs):
        assert o.shape == r.shape, (o.shape, r.shape)
        assert o.dtype == r.dtype, (o.dtype, r.dtype)
        err = float(jnp.max(jnp.abs(o.astype(jnp.float32) - r.astype(jnp.float32))))
        assert err < 1e-4, f"max abs err {err}"

    print("KERNEL_OK")
</pallas_src>

<mosaic_0001>
module attributes {stable_mosaic.version = 11 : i64} {
  func.func @_fmap_att_kernel(%arg0: i32, %arg1: i32, %arg2: memref<16x6xf32, #tpu.memory_space<vmem>>, %arg3: memref<16x1xf32, #tpu.memory_space<vmem>>, %arg4: memref<16x3xf32, #tpu.memory_space<vmem>>, %arg5: memref<16x3xf32, #tpu.memory_space<vmem>>, %arg6: memref<2xf32, #tpu.memory_space<smem>>, %arg7: memref<1x4x256xf32, #tpu.memory_space<vmem>>, %arg8: memref<1x4x256xf32, #tpu.memory_space<vmem>>, %arg9: memref<1x4x256xf32, #tpu.memory_space<vmem>>, %arg10: memref<1x4x256xf32, #tpu.memory_space<vmem>>, %arg11: memref<1x1x256xf32, #tpu.memory_space<vmem>>, %arg12: memref<1x1x256xf32, #tpu.memory_space<vmem>>) attributes {dimension_semantics = [#tpu.dimension_semantics<parallel>, #tpu.dimension_semantics<parallel>], iteration_bounds = array<i64: 2, 1>, scalar_prefetch = 0 : i64, scratch_operands = 0 : i64, tpu.core_type = #tpu.core_type<tc>, window_params = [{pipeline_mode = #tpu.pipeline_mode<synchronous>, transform_indices = @transform_0, window_bounds = array<i64: 16, 6>}, {pipeline_mode = #tpu.pipeline_mode<synchronous>, transform_indices = @transform_1, window_bounds = array<i64: 16, 1>}, {pipeline_mode = #tpu.pipeline_mode<synchronous>, transform_indices = @transform_2, window_bounds = array<i64: 16, 3>}, {pipeline_mode = #tpu.pipeline_mode<synchronous>, transform_indices = @transform_3, window_bounds = array<i64: 16, 3>}, {transform_indices = @transform_4, window_bounds = array<i64: 2>}, {transform_indices = @transform_5, window_bounds = array<i64: 1, 4, 256>}, {transform_indices = @transform_6, window_bounds = array<i64: 1, 4, 256>}, {transform_indices = @transform_7, window_bounds = array<i64: 1, 4, 256>}, {transform_indices = @transform_8, window_bounds = array<i64: 1, 4, 256>}, {transform_indices = @transform_9, window_bounds = array<i64: 1, 1, 256>}, {transform_indices = @transform_10, window_bounds = array<i64: 1, 1, 256>}]} {
    %c0 = arith.constant 0 : index
    %c0_0 = arith.constant 0 : index
    %c0_1 = arith.constant 0 : index
    %0 = vector.load %arg7[%c0, %c0_0, %c0_1] : memref<1x4x256xf32, #tpu.memory_space<vmem>>, vector<1x4x256xf32>
    %1 = vector.shape_cast %0 : vector<1x4x256xf32> to vector<4x256xf32>
    %c0_2 = arith.constant 0 : index
    %c0_3 = arith.constant 0 : index
    %c0_4 = arith.constant 0 : index
    %2 = vector.load %arg8[%c0_2, %c0_3, %c0_4] : memref<1x4x256xf32, #tpu.memory_space<vmem>>, vector<1x4x256xf32>
    %3 = vector.shape_cast %2 : vector<1x4x256xf32> to vector<4x256xf32>
    %cst = arith.constant dense<0.000000e+00> : vector<256xf32>
    %4 = vector.multi_reduction <add>, %1, %cst [0] : vector<4x256xf32> to vector<256xf32>
    %5 = vector.shape_cast %4 : vector<256xf32> to vector<1x256xf32>
    %cst_5 = arith.constant 2.500000e-01 : f32
    %6 = vector.broadcast %cst_5 : f32 to vector<1x256xf32>
    %7 = arith.mulf %5, %6 : vector<1x256xf32>
    %cst_6 = arith.constant dense<0.000000e+00> : vector<256xf32>
    %8 = vector.multi_reduction <add>, %3, %cst_6 [0] : vector<4x256xf32> to vector<256xf32>
    %9 = vector.shape_cast %8 : vector<256xf32> to vector<1x256xf32>
    %cst_7 = arith.constant 2.500000e-01 : f32
    %10 = vector.broadcast %cst_7 : f32 to vector<1x256xf32>
    %11 = arith.mulf %9, %10 : vector<1x256xf32>
    %12 = tpu.iota {dimensions = array<i32: 1>} : vector<1x256xi32>
    %c16_i32 = arith.constant 16 : i32
    %c0_i32 = arith.constant 0 : i32
    %13 = arith.cmpi eq, %c16_i32, %c0_i32 : i32
    %c1_i32 = arith.constant 1 : i32
    %14 = arith.select %13, %c1_i32, %c16_i32 : i32
    %15 = vector.broadcast %14 : i32 to vector<1x256xi32>
    %16 = arith.remsi %12, %15 : vector<1x256xi32>
    %c0_i32_8 = arith.constant 0 : i32
    %17 = vector.broadcast %c0_i32_8 : i32 to vector<1x256xi32>
    %18 = arith.cmpi ne, %16, %17 : vector<1x256xi32>
    %c0_i32_9 = arith.constant 0 : i32
    %19 = vector.broadcast %c0_i32_9 : i32 to vector<1x256xi32>
    %20 = arith.cmpi slt, %16, %19 : vector<1x256xi32>
    %c0_i32_10 = arith.constant 0 : i32
    %21 = arith.cmpi slt, %14, %c0_i32_10 : i32
    %22 = vector.broadcast %21 : i1 to vector<1x256xi1>
    %23 = vector.broadcast %22 : vector<1x256xi1> to vector<1x256xi1>
    %24 = arith.xori %20, %23 : vector<1x256xi1>
    %25 = arith.andi %24, %18 : vector<1x256xi1>
    %26 = vector.broadcast %14 : i32 to vector<1x256xi32>
    %27 = arith.addi %16, %26 : vector<1x256xi32>
    %28 = arith.select %25, %27, %16 : vector<1x256xi1>, vector<1x256xi32>
    %c0_i32_11 = arith.constant 0 : i32
    %29 = vector.broadcast %c0_i32_11 : i32 to vector<1x256xi32>
    %30 = arith.cmpi ne, %28, %29 : vector<1x256xi32>
    %c16_i32_12 = arith.constant 16 : i32
    %c0_i32_13 = arith.constant 0 : i32
    %31 = arith.cmpi eq, %c16_i32_12, %c0_i32_13 : i32
    %c1_i32_14 = arith.constant 1 : i32
    %32 = arith.select %31, %c1_i32_14, %c16_i32_12 : i32
    %33 = vector.broadcast %32 : i32 to vector<1x256xi32>
    %34 = arith.remsi %12, %33 : vector<1x256xi32>
    %c0_i32_15 = arith.constant 0 : i32
    %35 = vector.broadcast %c0_i32_15 : i32 to vector<1x256xi32>
    %36 = arith.cmpi ne, %34, %35 : vector<1x256xi32>
    %c0_i32_16 = arith.constant 0 : i32
    %37 = vector.broadcast %c0_i32_16 : i32 to vector<1x256xi32>
    %38 = arith.cmpi slt, %34, %37 : vector<1x256xi32>
    %c0_i32_17 = arith.constant 0 : i32
    %39 = arith.cmpi slt, %32, %c0_i32_17 : i32
    %40 = vector.broadcast %39 : i1 to vector<1x256xi1>
    %41 = vector.broadcast %40 : vector<1x256xi1> to vector<1x256xi1>
    %42 = arith.xori %38, %41 : vector<1x256xi1>
    %43 = arith.andi %42, %36 : vector<1x256xi1>
    %44 = vector.broadcast %32 : i32 to vector<1x256xi32>
    %45 = arith.addi %34, %44 : vector<1x256xi32>
    %46 = arith.select %43, %45, %34 : vector<1x256xi1>, vector<1x256xi32>
    %c15_i32 = arith.constant 15 : i32
    %47 = vector.broadcast %c15_i32 : i32 to vector<1x256xi32>
    %48 = arith.cmpi ne, %46, %47 : vector<1x256xi32>
    %c1_i32_18 = arith.constant 1 : i32
    %49 = tpu.dynamic_rotate %7 by %c1_i32_18 dim 1 : vector<1x256xf32>, i32 -> vector<1x256xf32>
    %cst_19 = arith.constant 0.000000e+00 : f32
    %50 = vector.broadcast %cst_19 : f32 to vector<1x256xf32>
    %51 = arith.select %30, %49, %50 : vector<1x256xi1>, vector<1x256xf32>
    %c255_i32 = arith.constant 255 : i32
    %52 = tpu.dynamic_rotate %7 by %c255_i32 dim 1 : vector<1x256xf32>, i32 -> vector<1x256xf32>
    %cst_20 = arith.constant 0.000000e+00 : f32
    %53 = vector.broadcast %cst_20 : f32 to vector<1x256xf32>
    %54 = arith.select %48, %52, %53 : vector<1x256xi1>, vector<1x256xf32>
    %c1_i32_21 = arith.constant 1 : i32
    %55 = tpu.dynamic_rotate %11 by %c1_i32_21 dim 1 : vector<1x256xf32>, i32 -> vector<1x256xf32>
    %cst_22 = arith.constant 0.000000e+00 : f32
    %56 = vector.broadcast %cst_22 : f32 to vector<1x256xf32>
    %57 = arith.select %30, %55, %56 : vector<1x256xi1>, vector<1x256xf32>
    %c255_i32_23 = arith.constant 255 : i32
    %58 = tpu.dynamic_rotate %11 by %c255_i32_23 dim 1 : vector<1x256xf32>, i32 -> vector<1x256xf32>
    %cst_24 = arith.constant 0.000000e+00 : f32
    %59 = vector.broadcast %cst_24 : f32 to vector<1x256xf32>
    %60 = arith.select %48, %58, %59 : vector<1x256xi1>, vector<1x256xf32>
    %c0_25 = arith.constant 0 : index
    %c0_26 = arith.constant 0 : index
    %61 = vector.load %arg2[%c0_25, %c0_26] : memref<16x6xf32, #tpu.memory_space<vmem>>, vector<16x6xf32>
    %c0_27 = arith.constant 0 : index
    %c0_28 = arith.constant 0 : index
    %62 = vector.load %arg3[%c0_27, %c0_28] : memref<16x1xf32, #tpu.memory_space<vmem>>, vector<16x1xf32>
    %63 = vector.extract_strided_slice %61 {offsets = [0, 0], sizes = [16, 1], strides = [1, 1]} : vector<16x6xf32> to vector<16x1xf32>
    %64 = vector.broadcast %63 : vector<16x1xf32> to vector<16x256xf32>
    %65 = vector.broadcast %51 : vector<1x256xf32> to vector<16x256xf32>
    %66 = arith.mulf %64, %65 : vector<16x256xf32>
    %67 = vector.broadcast %62 : vector<16x1xf32> to vector<16x256xf32>
    %68 = arith.addf %67, %66 : vector<16x256xf32>
    %69 = vector.extract_strided_slice %61 {offsets = [0, 1], sizes = [16, 1], strides = [1, 1]} : vector<16x6xf32> to vector<16x1xf32>
    %70 = vector.broadcast %69 : vector<16x1xf32> to vector<16x256xf32>
    %71 = vector.broadcast %7 : vector<1x256xf32> to vector<16x256xf32>
    %72 = arith.mulf %70, %71 : vector<16x256xf32>
    %73 = arith.addf %68, %72 : vector<16x256xf32>
    %74 = vector.extract_strided_slice %61 {offsets = [0, 2], sizes = [16, 1], strides = [1, 1]} : vector<16x6xf32> to vector<16x1xf32>
    %75 = vector.broadcast %74 : vector<16x1xf32> to vector<16x256xf32>
    %76 = vector.broadcast %54 : vector<1x256xf32> to vector<16x256xf32>
    %77 = arith.mulf %75, %76 : vector<16x256xf32>
    %78 = arith.addf %73, %77 : vector<16x256xf32>
    %79 = vector.extract_strided_slice %61 {offsets = [0, 3], sizes = [16, 1], strides = [1, 1]} : vector<16x6xf32> to vector<16x1xf32>
    %80 = vector.broadcast %79 : vector<16x1xf32> to vector<16x256xf32>
    %81 = vector.broadcast %57 : vector<1x256xf32> to vector<16x256xf32>
    %82 = arith.mulf %80, %81 : vector<16x256xf32>
    %83 = arith.addf %78, %82 : vector<16x256xf32>
    %84 = vector.extract_strided_slice %61 {offsets = [0, 4], sizes = [16, 1], strides = [1, 1]} : vector<16x6xf32> to vector<16x1xf32>
    %85 = vector.broadcast %84 : vector<16x1xf32> to vector<16x256xf32>
    %86 = vector.broadcast %11 : vector<1x256xf32> to vector<16x256xf32>
    %87 = arith.mulf %85, %86 : vector<16x256xf32>
    %88 = arith.addf %83, %87 : vector<16x256xf32>
    %89 = vector.extract_strided_slice %61 {offsets = [0, 5], sizes = [16, 1], strides = [1, 1]} : vector<16x6xf32> to vector<16x1xf32>
    %90 = vector.broadcast %89 : vector<16x1xf32> to vector<16x256xf32>
    %91 = vector.broadcast %60 : vector<1x256xf32> to vector<16x256xf32>
    %92 = arith.mulf %90, %91 : vector<16x256xf32>
    %93 = arith.addf %88, %92 : vector<16x256xf32>
    %cst_29 = arith.constant 0.000000e+00 : f32
    %94 = vector.broadcast %cst_29 : f32 to vector<16x256xf32>
    %95 = arith.maximumf %93, %94 : vector<16x256xf32>
    %c0_30 = arith.constant 0 : index
    %c0_31 = arith.constant 0 : index
    %96 = vector.load %arg4[%c0_30, %c0_31] : memref<16x3xf32, #tpu.memory_space<vmem>>, vector<16x3xf32>
    %c0_32 = arith.constant 0 : index
    %c0_33 = arith.constant 0 : index
    %97 = vector.load %arg5[%c0_32, %c0_33] : memref<16x3xf32, #tpu.memory_space<vmem>>, vector<16x3xf32>
    %98 = vector.extract_strided_slice %96 {offsets = [0, 0], sizes = [16, 1], strides = [1, 1]} : vector<16x3xf32> to vector<16x1xf32>
    %99 = vector.broadcast %98 : vector<16x1xf32> to vector<16x256xf32>
    %100 = arith.mulf %99, %95 : vector<16x256xf32>
    %cst_34 = arith.constant dense<0.000000e+00> : vector<256xf32>
    %101 = vector.multi_reduction <add>, %100, %cst_34 [0] : vector<16x256xf32> to vector<256xf32>
    %102 = vector.shape_cast %101 : vector<256xf32> to vector<1x256xf32>
    %103 = vector.extract_strided_slice %96 {offsets = [0, 1], sizes = [16, 1], strides = [1, 1]} : vector<16x3xf32> to vector<16x1xf32>
    %104 = vector.broadcast %103 : vector<16x1xf32> to vector<16x256xf32>
    %105 = arith.mulf %104, %95 : vector<16x256xf32>
    %cst_35 = arith.constant dense<0.000000e+00> : vector<256xf32>
    %106 = vector.multi_reduction <add>, %105, %cst_35 [0] : vector<16x256xf32> to vector<256xf32>
    %107 = vector.shape_cast %106 : vector<256xf32> to vector<1x256xf32>
    %108 = vector.extract_strided_slice %96 {offsets = [0, 2], sizes = [16, 1], strides = [1, 1]} : vector<16x3xf32> to vector<16x1xf32>
    %109 = vector.broadcast %108 : vector<16x1xf32> to vector<16x256xf32>
    %110 = arith.mulf %109, %95 : vector<16x256xf32>
    %cst_36 = arith.constant dense<0.000000e+00> : vector<256xf32>
    %111 = vector.multi_reduction <add>, %110, %cst_36 [0] : vector<16x256xf32> to vector<256xf32>
    %112 = vector.shape_cast %111 : vector<256xf32> to vector<1x256xf32>
    %113 = vector.extract_strided_slice %97 {offsets = [0, 0], sizes = [16, 1], strides = [1, 1]} : vector<16x3xf32> to vector<16x1xf32>
    %114 = vector.broadcast %113 : vector<16x1xf32> to vector<16x256xf32>
    %115 = arith.mulf %114, %95 : vector<16x256xf32>
    %cst_37 = arith.constant dense<0.000000e+00> : vector<256xf32>
    %116 = vector.multi_reduction <add>, %115, %cst_37 [0] : vector<16x256xf32> to vector<256xf32>
    %117 = vector.shape_cast %116 : vector<256xf32> to vector<1x256xf32>
    %118 = vector.extract_strided_slice %97 {offsets = [0, 1], sizes = [16, 1], strides = [1, 1]} : vector<16x3xf32> to vector<16x1xf32>
    %119 = vector.broadcast %118 : vector<16x1xf32> to vector<16x256xf32>
    %120 = arith.mulf %119, %95 : vector<16x256xf32>
    %cst_38 = arith.constant dense<0.000000e+00> : vector<256xf32>
    %121 = vector.multi_reduction <add>, %120, %cst_38 [0] : vector<16x256xf32> to vector<256xf32>
    %122 = vector.shape_cast %121 : vector<256xf32> to vector<1x256xf32>
    %123 = vector.extract_strided_slice %97 {offsets = [0, 2], sizes = [16, 1], strides = [1, 1]} : vector<16x3xf32> to vector<16x1xf32>
    %124 = vector.broadcast %123 : vector<16x1xf32> to vector<16x256xf32>
    %125 = arith.mulf %124, %95 : vector<16x256xf32>
    %cst_39 = arith.constant dense<0.000000e+00> : vector<256xf32>
    %126 = vector.multi_reduction <add>, %125, %cst_39 [0] : vector<16x256xf32> to vector<256xf32>
    %127 = vector.shape_cast %126 : vector<256xf32> to vector<1x256xf32>
    %c0_40 = arith.constant 0 : index
    %128 = memref.load %arg6[%c0_40] : memref<2xf32, #tpu.memory_space<smem>>
    %c1_i32_41 = arith.constant 1 : i32
    %129 = tpu.dynamic_rotate %102 by %c1_i32_41 dim 1 : vector<1x256xf32>, i32 -> vector<1x256xf32>
    %cst_42 = arith.constant 0.000000e+00 : f32
    %130 = vector.broadcast %cst_42 : f32 to vector<1x256xf32>
    %131 = arith.select %30, %129, %130 : vector<1x256xi1>, vector<1x256xf32>
    %132 = vector.broadcast %128 : f32 to vector<1x256xf32>
    %133 = arith.addf %132, %131 : vector<1x256xf32>
    %134 = arith.addf %133, %107 : vector<1x256xf32>
    %c255_i32_43 = arith.constant 255 : i32
    %135 = tpu.dynamic_rotate %112 by %c255_i32_43 dim 1 : vector<1x256xf32>, i32 -> vector<1x256xf32>
    %cst_44 = arith.constant 0.000000e+00 : f32
    %136 = vector.broadcast %cst_44 : f32 to vector<1x256xf32>
    %137 = arith.select %48, %135, %136 : vector<1x256xi1>, vector<1x256xf32>
    %138 = arith.addf %134, %137 : vector<1x256xf32>
    %c1 = arith.constant 1 : index
    %139 = memref.load %arg6[%c1] : memref<2xf32, #tpu.memory_space<smem>>
    %c1_i32_45 = arith.constant 1 : i32
    %140 = tpu.dynamic_rotate %117 by %c1_i32_45 dim 1 : vector<1x256xf32>, i32 -> vector<1x256xf32>
    %cst_46 = arith.constant 0.000000e+00 : f32
    %141 = vector.broadcast %cst_46 : f32 to vector<1x256xf32>
    %142 = arith.select %30, %140, %141 : vector<1x256xi1>, vector<1x256xf32>
    %143 = vector.broadcast %139 : f32 to vector<1x256xf32>
    %144 = arith.addf %143, %142 : vector<1x256xf32>
    %145 = arith.addf %144, %122 : vector<1x256xf32>
    %c255_i32_47 = arith.constant 255 : i32
    %146 = tpu.dynamic_rotate %127 by %c255_i32_47 dim 1 : vector<1x256xf32>, i32 -> vector<1x256xf32>
    %cst_48 = arith.constant 0.000000e+00 : f32
    %147 = vector.broadcast %cst_48 : f32 to vector<1x256xf32>
    %148 = arith.select %48, %146, %147 : vector<1x256xi1>, vector<1x256xf32>
    %149 = arith.addf %145, %148 : vector<1x256xf32>
    %150 = arith.negf %138 : vector<1x256xf32>
    %151 = math.exp %150 : vector<1x256xf32>
    %cst_49 = arith.constant 1.000000e+00 : f32
    %152 = vector.broadcast %cst_49 : f32 to vector<1x256xf32>
    %153 = arith.addf %152, %151 : vector<1x256xf32>
    %154 = arith.divf %152, %153 : vector<1x256xf32>
    %155 = arith.negf %149 : vector<1x256xf32>
    %156 = math.exp %155 : vector<1x256xf32>
    %cst_50 = arith.constant 1.000000e+00 : f32
    %157 = vector.broadcast %cst_50 : f32 to vector<1x256xf32>
    %158 = arith.addf %157, %156 : vector<1x256xf32>
    %159 = arith.divf %157, %158 : vector<1x256xf32>
    %c0_51 = arith.constant 0 : index
    %c0_52 = arith.constant 0 : index
    %c0_53 = arith.constant 0 : index
    %160 = vector.load %arg11[%c0_51, %c0_52, %c0_53] : memref<1x1x256xf32, #tpu.memory_space<vmem>>, vector<1x1x256xf32>
    %161 = vector.shape_cast %160 : vector<1x1x256xf32> to vector<1x256xf32>
    %162 = vector.shape_cast %154 : vector<1x256xf32> to vector<1x1x256xf32>
    tpu.vector_store %arg11[%c0_51, %c0_52, %c0_53], %162 {strides = array<i32>} : memref<1x1x256xf32, #tpu.memory_space<vmem>>, vector<1x1x256xf32>,
    %c0_54 = arith.constant 0 : index
    %c0_55 = arith.constant 0 : index
    %c0_56 = arith.constant 0 : index
    %163 = vector.load %arg12[%c0_54, %c0_55, %c0_56] : memref<1x1x256xf32, #tpu.memory_space<vmem>>, vector<1x1x256xf32>
    %164 = vector.shape_cast %163 : vector<1x1x256xf32> to vector<1x256xf32>
    %165 = vector.shape_cast %159 : vector<1x256xf32> to vector<1x1x256xf32>
    tpu.vector_store %arg12[%c0_54, %c0_55, %c0_56], %165 {strides = array<i32>} : memref<1x1x256xf32, #tpu.memory_space<vmem>>, vector<1x1x256xf32>,
    %166 = vector.broadcast %154 : vector<1x256xf32> to vector<4x256xf32>
    %167 = arith.mulf %1, %166 : vector<4x256xf32>
    %c0_57 = arith.constant 0 : index
    %c0_58 = arith.constant 0 : index
    %c0_59 = arith.constant 0 : index
    %168 = vector.load %arg9[%c0_57, %c0_58, %c0_59] : memref<1x4x256xf32, #tpu.memory_space<vmem>>, vector<1x4x256xf32>
    %169 = vector.shape_cast %168 : vector<1x4x256xf32> to vector<4x256xf32>
    %170 = vector.shape_cast %167 : vector<4x256xf32> to vector<1x4x256xf32>
    tpu.vector_store %arg9[%c0_57, %c0_58, %c0_59], %170 {strides = array<i32>} : memref<1x4x256xf32, #tpu.memory_space<vmem>>, vector<1x4x256xf32>,
    %171 = vector.broadcast %159 : vector<1x256xf32> to vector<4x256xf32>
    %172 = arith.mulf %3, %171 : vector<4x256xf32>
    %c0_60 = arith.constant 0 : index
    %c0_61 = arith.constant 0 : index
    %c0_62 = arith.constant 0 : index
    %173 = vector.load %arg10[%c0_60, %c0_61, %c0_62] : memref<1x4x256xf32, #tpu.memory_space<vmem>>, vector<1x4x256xf32>
    %174 = vector.shape_cast %173 : vector<1x4x256xf32> to vector<4x256xf32>
    %175 = vector.shape_cast %172 : vector<4x256xf32> to vector<1x4x256xf32>
    tpu.vector_store %arg10[%c0_60, %c0_61, %c0_62], %175 {strides = array<i32>} : memref<1x4x256xf32, #tpu.memory_space<vmem>>, vector<1x4x256xf32>,
    return
  }
  func.func @transform_0(%arg0: i32, %arg1: i32) -> (i32, i32) {
    %c0_i32 = arith.constant 0 : i32
    %c0_i32_0 = arith.constant 0 : i32
    %c0_i32_1 = arith.constant 0 : i32
    return %c0_i32, %c0_i32_0 : i32, i32
  }
  func.func @transform_1(%arg0: i32, %arg1: i32) -> (i32, i32) {
    %c0_i32 = arith.constant 0 : i32
    %c0_i32_0 = arith.constant 0 : i32
    %c0_i32_1 = arith.constant 0 : i32
    return %c0_i32, %c0_i32_0 : i32, i32
  }
  func.func @transform_2(%arg0: i32, %arg1: i32) -> (i32, i32) {
    %c0_i32 = arith.constant 0 : i32
    %c0_i32_0 = arith.constant 0 : i32
    %c0_i32_1 = arith.constant 0 : i32
    return %c0_i32, %c0_i32_0 : i32, i32
  }
  func.func @transform_3(%arg0: i32, %arg1: i32) -> (i32, i32) {
    %c0_i32 = arith.constant 0 : i32
    %c0_i32_0 = arith.constant 0 : i32
    %c0_i32_1 = arith.constant 0 : i32
    return %c0_i32, %c0_i32_0 : i32, i32
  }
  func.func @transform_4(%arg0: i32, %arg1: i32) -> i32 {
    %c0_i32 = arith.constant 0 : i32
    %c0_i32_0 = arith.constant 0 : i32
    return %c0_i32 : i32
  }
  func.func @transform_5(%arg0: i32, %arg1: i32) -> (i32, i32, i32) {
    %c0_i32 = arith.constant 0 : i32
    %c0_i32_0 = arith.constant 0 : i32
    return %arg0, %c0_i32, %arg1 : i32, i32, i32
  }
  func.func @transform_6(%arg0: i32, %arg1: i32) -> (i32, i32, i32) {
    %c0_i32 = arith.constant 0 : i32
    %c0_i32_0 = arith.constant 0 : i32
    return %arg0, %c0_i32, %arg1 : i32, i32, i32
  }
  func.func @transform_7(%arg0: i32, %arg1: i32) -> (i32, i32, i32) {
    %c0_i32 = arith.constant 0 : i32
    %c0_i32_0 = arith.constant 0 : i32
    return %arg0, %c0_i32, %arg1 : i32, i32, i32
  }
  func.func @transform_8(%arg0: i32, %arg1: i32) -> (i32, i32, i32) {
    %c0_i32 = arith.constant 0 : i32
    %c0_i32_0 = arith.constant 0 : i32
    return %arg0, %c0_i32, %arg1 : i32, i32, i32
  }
  func.func @transform_9(%arg0: i32, %arg1: i32) -> (i32, i32, i32) {
    %c0_i32 = arith.constant 0 : i32
    %c0_i32_0 = arith.constant 0 : i32
    return %arg0, %c0_i32, %arg1 : i32, i32, i32
  }
  func.func @transform_10(%arg0: i32, %arg1: i32) -> (i32, i32, i32) {
    %c0_i32 = arith.constant 0 : i32
    %c0_i32_0 = arith.constant 0 : i32
    return %arg0, %c0_i32, %arg1 : i32, i32, i32
  }
}

</mosaic_0001>

<bundles_post_ra>
// kernel: tpu_custom_call.1
= control target key start
LH: loop header
LB: loop body
LE: loop exit
PB: predicated region body
PF: predicated region fallthrough
CT: control target
= control target key end

     0   :  { %s2253_s0 = inlined_call_operand.vmem [shape: f32[16,6], index: 0, kind: input, shape index: {}]   ;;  %s2254_s1 = inlined_call_operand.vmem [shape: f32[16,1], index: 1, kind: input, shape index: {}]   ;;  %s2255_s2 = inlined_call_operand.vmem [shape: f32[16,3], index: 2, kind: input, shape index: {}]   ;;  %s2256_s3 = inlined_call_operand.vmem [shape: f32[16,3], index: 3, kind: input, shape index: {}]   ;;  %s2257_s4 = inlined_call_operand.vmem [shape: f32[2], index: 4, kind: input, shape index: {}]   ;;  %s2258_s5 = inlined_call_operand.vmem [shape: f32[2,4,256], index: 5, kind: input, shape index: {}]   ;;  %s2259_s6 = inlined_call_operand.vmem [shape: f32[2,4,256], index: 6, kind: input, shape index: {}]   ;;  %s2260_s7 = inlined_call_operand.hbm [shape: f32[2,4,256], index: 7, kind: output, shape index: {0}]   ;;  %s2261_s8 = inlined_call_operand.hbm [shape: f32[2,4,256], index: 8, kind: output, shape index: {1}]   ;;  %s2262_s9 = inlined_call_operand.hbm [shape: f32[2,1,256], index: 9, kind: output, shape index: {2}]   ;;  %s2263_s10 = inlined_call_operand.hbm [shape: f32[2,1,256], index: 10, kind: output, shape index: {3}]  }
   0x1   :  { %2268 = sst [smem:[#allocation15_spill]] %s2253_s0 }
   0x2   :  { %2269 = sst [smem:[#allocation16_spill]] %s2254_s1 }
   0x3   :  { %2270 = sst [smem:[#allocation17_spill]] %s2255_s2 }
   0x4   :  { %2271 = sst [smem:[#allocation18_spill]] %s2256_s3 }
   0x5   :  { %2272 = sst [smem:[#allocation19_spill]] %s2257_s4 }
   0x6   :  { %2273 = sst [smem:[#allocation20_spill]] %s2258_s5 }
   0x7   :  { %2274 = sst [smem:[#allocation21_spill]] %s2259_s6 }
   0x8   :  { %16 = vsyncpa [#allocation4], 0 }
   0x9   :  { %17 = vsyncpa [#allocation3], 0 }
   0xa   :  { %19 = vsyncpa [#allocation3 + $0x1], 0 }
   0xb   :  { %20 = vsyncpa [#allocation7], 0 }
   0xc   :  { %22 = vsyncpa [#allocation7 + $0x1], 0 }
   0xd   :  { %23 = vsyncpa [#allocation10], 0 }
   0xe   :  { %25 = vsyncpa [#allocation10 + $0x1], 0  ;;  %s1743_s13 = smov 0   ;;  %s1745_s14 = smov 0  }
   0xf   :  { %s1747_s15 = smov 0   ;;  %s1749_s16 = smov 0  }
  0x10   :  { %s1751_s17 = smov 0   ;;  %s1753_s18 = smov 0  }
  0x11 LB: > { %s1774_s19 = sadd.s32 4294967295, %s1677_s18   ;;  %s2264_s20 = sadd.s32 4294967294, %s1677_s18   ;;  %s1677_s18 = sphi %s1753_s18, %s31_s18   ;;  %s1673_s17 = sphi %s1751_s17, %s2311_s17   ;;  %s1669_s16 = sphi %s1749_s16, %s2310_s16   ;;  %s1665_s15 = sphi %s1747_s15, %s2309_s15   ;;  %s1661_s14 = sphi %s1745_s14, %s2308_s14   ;;  %s1657_s13 = sphi %s1743_s13, %s2307_s13  }
  0x12   : > { %s43_s21 = sadd.s32 1, %s1673_s17  ;;  %s213_s22 = sadd.s32 1, %s1665_s15 }
  0x13   : > { %p45_p0 = scmp.ge.s32.totalorder %s43_s21, 2  ;;  %p223_p1 = scmp.ne.s32.totalorder %s1665_s15, %s1661_s14 }
  0x14   : > { %p224_p2 = scmp.eq.s32.totalorder %s1774_s19, 1  ;;  %p229_p3 = scmp.ne.s32.totalorder %s1661_s14, %s1657_s13 }
  0x15   : > { %s2313_s21 = smov (%p45_p0, %s43_s21), 0  ;;  %p230_p5 = scmp.eq.s32.totalorder %s2264_s20, 1 }
  0x16   : > { %p1786_p4 = por %p224_p2, %p223_p1  ;;  %s208_s24 = ssub.s32 %s1673_s17, %s2313_s21 }
  0x17   : > { %p1329_p6 = scmp.ge.s32.totalorder %s1677_s18, 1  ;;  %p211_p7 = scmp.eq.s32.totalorder %s208_s24, 0 }
  0x18   : > { %p1795_p8 = por %p230_p5, %p229_p3  ;;  %p321_p9 = scmp.lt.s32.totalorder %s1677_s18, 3 }
  0x19   : > { %s1801_s26 = scalar_select %p211_p7, %s1665_s15, %s213_s22  }
  0x1a   : > { %p322_p10 = pnand %p1329_p6, %p321_p9  ;;  %p1392_p11 = scmp.eq.s32.totalorder %s1774_s19, 0 }
  0x1b   : > { %s2277_s4 = sld [smem:[#allocation19_spill]]  ;;  %s1679_s30 = smov [#allocation2]  }
  0x1c   : > { %p1375_p12 = pneg %p322_p10 }
  0x1e   : > { %p1376_p13 = pnand %p1392_p11, %p1375_p12  ;;  %384 = sbr.rel (%p322_p10) target bundleno = 470 (0x1d6), region = 48 }
  0x21   : > { %s345_s29 = sshll.u32 %s2277_s4, 4  ;;  %s346_s29 = int_to_ptr.vmem [resolvable:$true] %s345_s29 }
  0x22   : > { %1378 = dma.vmem_to_smem (!%p1376_p13), %s346_s29, 16, %s1679_s30, [#allocation4]  }
  0x23   : > { %1640 = dma.done.wait (%p1392_p11), [#allocation4], 16  }
  0x24   : > { %1642 = vsyncadd (%p1392_p11), [#allocation4], 4294967280 }
  0x25   : > { %391 = sfence }
  0x26   : > { %s2278_s1 = sld [smem:[#allocation16_spill]]  ;;  %v1680_v2 = vmov 0   ;;  %p453_p0 = scmp.lt.s32.totalorder %s1669_s16, 1  ;;  %v1681_v3 = vmov 2   ;;  %v1682_v6 = vmov 1   ;;  %vm484_vm0 = vcmask 1043456  }
  0x27   : > { %s2279_s0 = sld [smem:[#allocation15_spill]]  ;;  %1453 = vset.pattern.permute.xlu1 %v1680_v2  ;;  %1452 = vset.pattern.permute.xlu2 %v1680_v2  ;;  %v1683_v15 = vmov 4   ;;  %v1684_v33 = vmov 3   ;;  %s1685_s20 = smov 127   ;;  %v1687_v48 = vmov 5   ;;  %v523_v60 = vlaneseq }
  0x28   : > { %1456 = vset.pattern.permute.xlu0 %v1681_v3  ;;  %s454_s27 = scalar_select %p453_p0, %s1669_s16, 1  ;;  %vm1003_vm15 = vcmask 1040384  }
  0x29   : > { %s2280_s5 = sld [smem:[#allocation20_spill]]  ;;  %v1906_v63 = vand.u32 127, %v523_v60  ;;  %s2055_s12 = sand.u32 1, %s1661_s14  }
  0x2a   : > { %s1359_s28 = sshll.u32 %s454_s27, 3  ;;  %s2281_s6 = sld [smem:[#allocation21_spill]] }
  0x2b   : > { %s2282_s2 = sld [smem:[#allocation17_spill]]  ;;  %vm558_vm1 = vcmp.lt.s32.totalorder %v1906_v63, 1  ;;  %vm567_vm4 = vcmp.lt.s32.totalorder %v1906_v63, 127  ;;  %s2265_s22 = sshll.u32 %s1669_s16, 1 }
  0x2c   : > { %v590_v0 = vld [vmem:[%s2278_s1] sm:$0xff]  ;;  %v591_v4 = vld [vmem:[%s2278_s1 + $0x8] sm:$0xff]  ;;  %s2283_s3 = sld [smem:[#allocation18_spill]]  ;;  %s2267_s24 = sshll.u32 %s2055_s12, 1 }
  0x2d   : > { %v1813_v1 = vld [vmem:[%s2279_s0] sm:$0xff]  ;;  %610 = vperm.xlu1 %1453, %v590_v0   ;;  %v1841_v10 = vld [vmem:[%s2279_s0 + $0x8] sm:$0xff]  ;;  %s2065_s30 = scalar_lea.hbm %s2263_s10, %s2265_s22  ;;  %s2296_s0 = sshll.u32 %s2055_s12, 3 }
  0x2e   : > { %594 = vperm.xlu2 %1452, %v1813_v1   ;;  %639 = vperm.xlu0 %1456, %v1813_v1   ;;  %s1117_s22 = sshll.u32 %s2065_s30, 4  ;;  %s2112_s30 = scalar_lea.vmem [#allocation6], %s2296_s0  ;;  %s2108_s22 = int_to_ptr.hbm [resolvable:$true] %s1117_s22 }
  0x2f   : > { %s460_s11 = scalar_lea.vmem %s2280_s5, %s1359_s28 }
  0x30   : > { %v1828_v5 = vld [vmem:[%s460_s11] sm:$0xff]  ;;  %s470_s27 = scalar_lea.vmem %s2281_s6, %s1359_s28  ;;  %s1686_s28 = smov 1  }
  0x31   : > { %479 = vst [vmem:[#allocation1] ss:$2 sm:$0xff] %v1828_v5  ;;  %v1836_v7 = vld [vmem:[%s470_s27] sm:$0xff]  ;;  %v713_v49 = vld [vmem:[%s2282_s2 + $0x8] sm:$0xff]  ;;  %s2083_s27 = scalar_lea.vmem [#allocation9], %s2267_s24  ;;  %s1083_s11 = sshll.u32 %s2112_s30, 4  ;;  %s1084_s11 = int_to_ptr.vmem [resolvable:$true] %s1083_s11 }
  0x32   : > { %v712_v47 = vld [vmem:[%s2282_s2] sm:$0xff]  ;;  %v715_v50 = vld [vmem:[%s2283_s3 + $0x8] sm:$0xff]  ;;  %s1115_s29 = sshll.u32 %s2083_s27, 4  ;;  %s2297_s24 = sshll.u32 %s1669_s16, 1  ;;  %s2106_s29 = int_to_ptr.vmem [resolvable:$true] %s1115_s29 }
  0x33   : > { %v714_v51 = vld [vmem:[%s2283_s3] sm:$0xff]  ;;  %s2126_s0 = scalar_lea.hbm %s2262_s9, %s2297_s24  ;;  %s1517_s3 = sshra.s32 %s2108_s22, 4  ;;  %s1518_s3 = int_to_ptr.hbm [resolvable:$true] %s1517_s3 }
  0x34   : > { %s1519_s4 = scalar_lea.hbm %s1518_s3, 2  ;;  %s1523_s24 = scalar_lea.hbm %s2263_s10, 4 }
  0x35   : > { %1454 = vset.pattern.permute.xlu1 %v1682_v6  ;;  %p1520_p1 = scmp.ne.s32.totalorder %s1518_s3, %s1519_s4  ;;  %p1524_p5 = scmp.lt.s32.totalorder %s1518_s3, %s2263_s10 }
  0x36   : > { %615 = vperm.xlu2 %1452, %v591_v4   ;;  %623 = vperm.xlu1 %1454, %v1813_v1   ;;  %v530_v4 = vand.u32 15, %v1906_v63  ;;  %p1525_p6 = scmp.lt.s32.totalorder %s1523_s24, %s1519_s4 }
  0x37   : > { %1461 = vset.pattern.permute.xlu0 %v1683_v15  ;;  %p1521_p2 = pnand %p1520_p1, %p1786_p4 }
  0x38   : > { %v480_v8 = vld.sshfl [vmem:[#allocation1] sm:$0xff pattern:$0x75316420]  ;;  %v481_v9 = vld.sshfl [vmem:[#allocation1 + $0x8] sm:$0xff pattern:$0x75316420]  ;;  %p1526_p7 = por %p1525_p6, %p1524_p5 }
  0x39   : > { %v485_v11 = vsel %vm484_vm0, %v480_v8, 0.0  ;;  %502 = vst [vmem:[#allocation1] ss:$2 sm:$0xff] %v1836_v7  ;;  %v492_v12 = vsel %vm484_vm0, %v481_v9, 0.0  ;;  %vm1911_vm2 = vcmp.ne.s32.totalorder %v530_v4, 0  ;;  %vm1930_vm5 = vcmp.ne.s32.totalorder %v530_v4, 15  ;;  %p1522_p3 = pneg %p1521_p2 }
  0x3a   : > { %v486_v13 = vrot.slane %v485_v11, 4  ;;  %v493_v14 = vrot.slane %v492_v12, 4 }
  0x3b   : > { %p1527_p9 = pnand %p1526_p7, %p1522_p3 }
  0x3c   : > { %v487_v16 = vadd.f32 %v486_v13, %v485_v11  ;;  %v494_v17 = vadd.f32 %v493_v14, %v492_v12 }
  0x3e   : > { %1455 = vset.pattern.permute.xlu2 %v1682_v6  ;;  %1457 = vset.pattern.permute.xlu1 %v1681_v3  ;;  %v488_v18 = vrot.slane %v487_v16, 2  ;;  %v495_v19 = vrot.slane %v494_v17, 2 }
  0x3f   : > { %627 = vperm.xlu2 %1455, %v1841_v10  }
  0x40   : > { %v489_v20 = vadd.f32 %v488_v18, %v487_v16  ;;  %v503_v21 = vld.sshfl [vmem:[#allocation1] sm:$0xff pattern:$0x75316420]  ;;  %v496_v22 = vadd.f32 %v495_v19, %v494_v17  ;;  %v504_v23 = vld.sshfl [vmem:[#allocation1 + $0x8] sm:$0xff pattern:$0x75316420] }
  0x41   : > { %v507_v24 = vsel %vm484_vm0, %v503_v21, 0.0  ;;  %v514_v25 = vsel %vm484_vm0, %v504_v23, 0.0 }
  0x42   : > { %v490_v26 = vrot.slane %v489_v20, 1  ;;  %v508_v27 = vrot.slane %v507_v24, 4  ;;  %v515_v28 = vrot.slane %v514_v25, 4  ;;  %v497_v31 = vrot.slane %v496_v22, 1 }
  0x44   : > { %v491_v29 = vadd.f32 %v490_v26, %v489_v20  ;;  %v509_v30 = vadd.f32 %v508_v27, %v507_v24  ;;  %v516_v32 = vadd.f32 %v515_v28, %v514_v25  ;;  %v498_v38 = vadd.f32 %v497_v31, %v496_v22 }
  0x46   : > { %v1851_v34 = vmul.f32 0.25, %v491_v29  ;;  %v510_v35 = vrot.slane %v509_v30, 2  ;;  %v517_v36 = vrot.slane %v516_v32, 2  ;;  %v1857_v42 = vmul.f32 0.25, %v498_v38 }
  0x47   : > { %1458 = vset.pattern.permute.xlu2 %v1684_v33 }
  0x48   : > { %563 = vrot.lane.b32.xlu1 %v1851_v34, %s1685_s20  ;;  %554 = vrot.lane.b32.xlu0 %v1851_v34, %s1686_s28  ;;  %v511_v37 = vadd.f32 %v510_v35, %v509_v30  ;;  %v518_v39 = vadd.f32 %v517_v36, %v516_v32 }
  0x4a   : > { %v512_v40 = vrot.slane %v511_v37, 1  ;;  %v519_v43 = vrot.slane %v518_v39, 1 }
  0x4c   : > { %v513_v41 = vadd.f32 %v512_v40, %v511_v37  ;;  %v520_v45 = vadd.f32 %v519_v43, %v518_v39 }
  0x4e   : > { %v1859_v44 = vmul.f32 0.25, %v513_v41  ;;  %v1867_v46 = vmul.f32 0.25, %v520_v45 }
  0x50   : > { %572 = vrot.lane.b32.xlu2 %v1859_v44, %s1686_s28  ;;  %565 = vrot.lane.b32.xlu1 %v1857_v42, %s1685_s20 }
  0x51   : > { %556 = vrot.lane.b32.xlu0 %v1857_v42, %s1686_s28 }
  0x58   : > { %574 = vrot.lane.b32.xlu2 %v1867_v46, %s1686_s28  ;;  %582 = vrot.lane.b32.xlu1 %v1867_v46, %s1685_s20 }
  0x59   : > { %580 = vrot.lane.b32.xlu0 %v1859_v44, %s1685_s20 }
  0x60   : > { %657 = vperm.xlu2 %1458, %v1813_v1   ;;  %643 = vperm.xlu1 %1457, %v1841_v10  }
  0x61   : > { %679 = vperm.xlu0 %1461, %v1841_v10  }
  0x68   : > { %1460 = vset.pattern.permute.xlu2 %v1683_v15  ;;  %1459 = vset.pattern.permute.xlu1 %v1684_v33 }
  0x69   : > { %1462 = vset.pattern.permute.xlu0 %v1680_v2  ;;  %675 = vperm.xlu2 %1460, %v1813_v1  }
  0x6a   : > { %661 = vperm.xlu1 %1459, %v1841_v10   ;;  %599 = vperm.xlu0 %1462, %v1841_v10  }
  0x71   : > { %1464 = vset.pattern.permute.xlu2 %v1687_v48 }
  0x72   : > { %1463 = vset.pattern.permute.xlu1 %v1687_v48  ;;  %718 = vperm.xlu0 %1462, %v712_v47  }
  0x73   : > { %695 = vperm.xlu2 %1464, %v1841_v10   ;;  %691 = vperm.xlu1 %1463, %v1813_v1   ;;  %v525_v1 = vadd.s32 128, %v1906_v63 }
  0x7a   : > { %1469 = vset.pattern.permute.xlu0 %v1681_v3 }
  0x7b   : > { %1466 = vset.pattern.permute.xlu2 %v1680_v2  ;;  %1465 = vset.pattern.permute.xlu1 %v1680_v2 }
  0x7c   : > { %775 = vperm.xlu0 %1469, %v713_v49   ;;  %803 = vperm.xlu2 %1466, %v715_v50  }
  0x7d   : > { %798 = vperm.xlu1 %1465, %v714_v51  }
  0x84   : > { %1467 = vset.pattern.permute.xlu2 %v1681_v3 }
  0x85   : > { %723 = vperm.xlu1 %1465, %v713_v49   ;;  %851 = vperm.xlu2 %1467, %v714_v51  }
  0x88   : > { %v595_v52 = vpop.permute.xlu2 %594 }
  0x8d   : > { %1468 = vset.pattern.permute.xlu1 %v1681_v3  ;;  %771 = vperm.xlu2 %1467, %v712_v47  }
  0x8e   : > { %855 = vperm.xlu1 %1468, %v715_v50  }
  0x90   : > { %v1903_v53 = vpop.permute.xlu2 %615 }
  0x95   : > { %1471 = vset.pattern.permute.xlu2 %v1682_v6 }
  0x96   : > { %1470 = vset.pattern.permute.xlu1 %v1682_v6  ;;  %829 = vperm.xlu2 %1471, %v715_v50   ;;  %v537_v6 = vand.u32 15, %v525_v1 }
  0x97   : > { %825 = vperm.xlu1 %1470, %v714_v51  }
  0x98   : > { %vm1915_vm3 = vcmp.ne.s32.totalorder %v537_v6, 0  ;;  %vm1934_vm6 = vcmp.ne.s32.totalorder %v537_v6, 15 }
  0x99   : > { %v628_v54 = vpop.permute.xlu2 %627 }
  0x9e   : > { %749 = vperm.xlu2 %1471, %v713_v49  }
  0x9f   : > { %745 = vperm.xlu1 %1470, %v712_v47   ;;  %v611_v55 = vpop.permute.xlu1 %610 }
  0xa0   : > { %v640_v57 = vpop.permute.xlu0 %639 }
  0xa8   : > { %v624_v58 = vpop.permute.xlu1 %623 }
  0xa9   : > { %v630_v37 = vmul.f32 %v624_v58, %v1851_v34  ;;  %v631_v38 = vmul.f32 %v624_v58, %v1857_v42  ;;  %v633_v58 = vmul.f32 %v628_v54, %v1857_v42 }
  0xaa   : > { %v573_v56 = vpop.permute.xlu2 %572 }
  0xb2   : > { %v575_v59 = vpop.permute.xlu2 %574 }
  0xb3   : > { %v576_v28 = vsel %vm558_vm1, %v573_v56, %v575_v59  ;;  %v577_v29 = vsel %vm558_vm1, %v575_v59, %v573_v56  ;;  %v632_v56 = vmul.f32 %v628_v54, %v1851_v34 }
  0xb4   : > { %v578_v32 = vsel %vm1911_vm2, %v577_v29, 0.0  ;;  %v579_v33 = vsel %vm1915_vm3, %v576_v28, 0.0 }
  0xb5   : > { %v664_v41 = vperm.slane %v578_v32, 0  ;;  %v665_v43 = vperm.slane %v579_v33, 0 }
  0xba   : > { %v564_v61 = vpop.permute.xlu1 %563  ;;  %v555_v62 = vpop.permute.xlu0 %554 }
  0xbb   : > { %v658_v0 = vpop.permute.xlu2 %657 }
  0xbc   : > { %v666_v6 = vmul.f32 %v664_v41, %v658_v0 }
  0xc2   : > { %v566_v2 = vpop.permute.xlu1 %565 }
  0xc3   : > { %v557_v3 = vpop.permute.xlu0 %556  ;;  %v1923_v12 = vpop.permute.xlu2 %675  ;;  %v568_v23 = vsel %vm567_vm4, %v564_v61, %v566_v2  ;;  %v569_v24 = vsel %vm567_vm4, %v566_v2, %v564_v61 }
  0xc4   : > { %v559_v10 = vsel %vm558_vm1, %v555_v62, %v557_v3  ;;  %v560_v11 = vsel %vm558_vm1, %v557_v3, %v555_v62  ;;  %v570_v30 = vsel %vm1930_vm5, %v568_v23, 0.0  ;;  %v571_v31 = vsel %vm1934_vm6, %v569_v24, 0.0 }
  0xc5   : > { %v561_v15 = vsel %vm1911_vm2, %v560_v11, 0.0  ;;  %v562_v16 = vsel %vm1915_vm3, %v559_v10, 0.0  ;;  %v646_v39 = vperm.slane %v570_v30, 0  ;;  %v647_v40 = vperm.slane %v571_v31, 0 }
  0xc6   : > { %v602_v17 = vperm.slane %v561_v15, 0  ;;  %v603_v18 = vperm.slane %v562_v16, 0  ;;  %v667_v10 = vmul.f32 %v665_v43, %v658_v0 }
  0xc7   : > { %v648_v59 = vmul.f32 %v646_v39, %v640_v57  ;;  %v649_v61 = vmul.f32 %v647_v40, %v640_v57 }
  0xc8   : > { %v604_v25 = vmul.f32 %v602_v17, %v595_v52  ;;  %v605_v26 = vmul.f32 %v603_v18, %v595_v52 }
  0xca   : > { %v583_v13 = vpop.permute.xlu1 %582  ;;  %v618_v35 = vadd.f32 %v611_v55, %v604_v25  ;;  %v619_v36 = vadd.f32 %v611_v55, %v605_v26  ;;  %v682_v26 = vmul.f32 %v1923_v12, %v1859_v44 }
  0xcb   : > { %v581_v14 = vpop.permute.xlu0 %580 }
  0xcc   : > { %v634_v45 = vadd.f32 %v630_v37, %v618_v35  ;;  %v635_v47 = vadd.f32 %v631_v38, %v619_v36  ;;  %v584_v48 = vsel %vm567_vm4, %v581_v14, %v583_v13  ;;  %v585_v49 = vsel %vm567_vm4, %v583_v13, %v581_v14 }
  0xcd   : > { %v696_v27 = vpop.permute.xlu2 %695  ;;  %v586_v1 = vsel %vm1930_vm5, %v584_v48, 0.0  ;;  %v587_v2 = vsel %vm1934_vm6, %v585_v49, 0.0 }
  0xce   : > { %v652_v11 = vadd.f32 %v648_v59, %v634_v45  ;;  %v653_v13 = vadd.f32 %v649_v61, %v635_v47  ;;  %v698_v57 = vperm.slane %v586_v1, 0  ;;  %v699_v15 = vperm.slane %v587_v2, 0 }
  0xd0   : > { %v670_v24 = vadd.f32 %v666_v6, %v652_v11  ;;  %v671_v25 = vadd.f32 %v667_v10, %v653_v13  ;;  %v702_v35 = vmul.f32 %v698_v57, %v696_v27  ;;  %v703_v36 = vmul.f32 %v699_v15, %v696_v27 }
  0xd2   : > { %v644_v19 = vpop.permute.xlu1 %643 }
  0xd3   : > { %v680_v22 = vpop.permute.xlu0 %679  ;;  %v650_v34 = vmul.f32 %v646_v39, %v644_v19  ;;  %v651_v14 = vmul.f32 %v647_v40, %v644_v19  ;;  %v686_v39 = vadd.f32 %v682_v26, %v670_v24 }
  0xd4   : > { %v684_v28 = vmul.f32 %v680_v22, %v1859_v44  ;;  %v685_v19 = vmul.f32 %v680_v22, %v1867_v46 }
  0xd6   : > { %v804_v62 = vpop.permute.xlu2 %803 }
  0xdc   : > { %v662_v50 = vpop.permute.xlu1 %661  ;;  %v600_v51 = vpop.permute.xlu0 %599 }
  0xdd   : > { %v606_v52 = vmul.f32 %v602_v17, %v600_v51  ;;  %v607_v55 = vmul.f32 %v603_v18, %v600_v51  ;;  %v668_v16 = vmul.f32 %v664_v41, %v662_v50  ;;  %v669_v17 = vmul.f32 %v665_v43, %v662_v50 }
  0xdf   : > { %v620_v3 = vadd.f32 %v1903_v53, %v606_v52  ;;  %v621_v4 = vadd.f32 %v1903_v53, %v607_v55  ;;  %v683_v53 = vmul.f32 %v1923_v12, %v1867_v46  ;;  %v852_v41 = vpop.permute.xlu2 %851 }
  0xe1   : > { %v636_v42 = vadd.f32 %v632_v56, %v620_v3  ;;  %v637_v54 = vadd.f32 %v633_v58, %v621_v4  ;;  %v687_v40 = vadd.f32 %v683_v53, %v671_v25 }
  0xe3   : > { %v654_v18 = vadd.f32 %v650_v34, %v636_v42  ;;  %v655_v23 = vadd.f32 %v651_v14, %v637_v54 }
  0xe4   : > { %v719_v0 = vpop.permute.xlu0 %718 }
  0xe5   : > { %v672_v29 = vadd.f32 %v668_v16, %v654_v18  ;;  %v673_v30 = vadd.f32 %v669_v17, %v655_v23  ;;  %v692_v31 = vpop.permute.xlu1 %691 }
  0xe6   : > { %v700_v32 = vmul.f32 %v698_v57, %v692_v31  ;;  %v701_v33 = vmul.f32 %v699_v15, %v692_v31 }
  0xe7   : > { %v688_v37 = vadd.f32 %v684_v28, %v672_v29  ;;  %v689_v38 = vadd.f32 %v685_v19, %v673_v30  ;;  %v772_v58 = vpop.permute.xlu2 %771 }
  0xe8   : > { %v704_v12 = vadd.f32 %v700_v32, %v686_v39  ;;  %v705_v47 = vadd.f32 %v701_v33, %v687_v40 }
  0xe9   : > { %v706_v43 = vadd.f32 %v702_v35, %v688_v37  ;;  %v707_v45 = vadd.f32 %v703_v36, %v689_v38 }
  0xea   : > { %v1978_v46 = vmax.f32 %v704_v12, 0.0  ;;  %v1980_v22 = vmax.f32 %v705_v47, 0.0 }
  0xeb   : > { %v1974_v48 = vmax.f32 %v706_v43, 0.0  ;;  %v1976_v44 = vmax.f32 %v707_v45, 0.0 }
  0xec   : > { %v778_v1 = vmul.f32 %v772_v58, %v1978_v46  ;;  %v726_v11 = vmul.f32 %v719_v0, %v1978_v46  ;;  %v727_v13 = vmul.f32 %v719_v0, %v1980_v22  ;;  %v779_v0 = vmul.f32 %v772_v58, %v1980_v22 }
  0xed   : > { %v808_v52 = vmul.f32 %v804_v62, %v1974_v48  ;;  %v809_v55 = vmul.f32 %v804_v62, %v1976_v44  ;;  %v858_v37 = vmul.f32 %v852_v41, %v1978_v46  ;;  %v859_v38 = vmul.f32 %v852_v41, %v1980_v22 }
  0xee   : > { %v776_v49 = vpop.permute.xlu0 %775 }
  0xef   : > { %v799_v50 = vpop.permute.xlu1 %798  ;;  %v780_v56 = vmul.f32 %v776_v49, %v1974_v48  ;;  %v781_v23 = vmul.f32 %v776_v49, %v1976_v44 }
  0xf0   : > { %v806_v27 = vmul.f32 %v799_v50, %v1978_v46  ;;  %v807_v51 = vmul.f32 %v799_v50, %v1980_v22 }
  0xf1   : > { %v782_v4 = vadd.f32 %v780_v56, %v778_v1  ;;  %v789_v32 = vadd.f32 %v781_v23, %v779_v0 }
  0xf2   : > { %v810_v59 = vadd.f32 %v808_v52, %v806_v27  ;;  %v817_v61 = vadd.f32 %v809_v55, %v807_v51  ;;  %v830_v52 = vpop.permute.xlu2 %829 }
  0xf3   : > { %v783_v57 = vrot.slane %v782_v4, 4  ;;  %v790_v47 = vrot.slane %v789_v32, 4 }
  0xf4   : > { %v811_v2 = vrot.slane %v810_v59, 4  ;;  %v818_v3 = vrot.slane %v817_v61, 4 }
  0xf5   : > { %v784_v28 = vadd.f32 %v783_v57, %v782_v4  ;;  %v791_v1 = vadd.f32 %v790_v47, %v789_v32 }
  0xf6   : > { %v812_v6 = vadd.f32 %v811_v2, %v810_v59  ;;  %v819_v10 = vadd.f32 %v818_v3, %v817_v61  ;;  %v834_v3 = vmul.f32 %v830_v52, %v1974_v48 }
  0xf7   : > { %v724_v34 = vpop.permute.xlu1 %723  ;;  %v785_v43 = vrot.slane %v784_v28, 2 }
  0xf8   : > { %v813_v14 = vrot.slane %v812_v6, 2  ;;  %v820_v42 = vrot.slane %v819_v10, 2  ;;  %v728_v62 = vmul.f32 %v724_v34, %v1974_v48  ;;  %v729_v54 = vmul.f32 %v724_v34, %v1976_v44 }
  0xf9   : > { %v786_v61 = vadd.f32 %v785_v43, %v784_v28 }
  0xfa   : > { %v730_v15 = vadd.f32 %v728_v62, %v726_v11  ;;  %v737_v16 = vadd.f32 %v729_v54, %v727_v13  ;;  %v821_v17 = vadd.f32 %v820_v42, %v819_v10  ;;  %v814_v18 = vadd.f32 %v813_v14, %v812_v6  ;;  %v750_v23 = vpop.permute.xlu2 %749 }
  0xfb   : > { %v835_v11 = vmul.f32 %v830_v52, %v1976_v44  ;;  %v787_v14 = vrot.slane %v786_v61, 1  ;;  %v792_v42 = vrot.slane %v791_v1, 2  ;;  %v754_v0 = vmul.f32 %v750_v23, %v1974_v48 }
  0xfc   : > { %v731_v24 = vrot.slane %v730_v15, 4  ;;  %v738_v25 = vrot.slane %v737_v16, 4  ;;  %v822_v26 = vrot.slane %v821_v17, 1  ;;  %v815_v53 = vrot.slane %v814_v18, 1 }
  0xfd   : > { %v755_v28 = vmul.f32 %v750_v23, %v1976_v44 }
  0xfe   : > { %v732_v19 = vadd.f32 %v731_v24, %v730_v15  ;;  %v739_v29 = vadd.f32 %v738_v25, %v737_v16  ;;  %v823_v30 = vadd.f32 %v822_v26, %v821_v17  ;;  %v816_v31 = vadd.f32 %v815_v53, %v814_v18 }
  0xff   : > { %v788_v18 = vadd.f32 %v787_v14, %v786_v61  ;;  %v793_v26 = vadd.f32 %v792_v42, %v791_v1 }
 0x100   : > { %v733_v33 = vrot.slane %v732_v19, 2  ;;  %v740_v35 = vrot.slane %v739_v29, 2  ;;  %v856_v36 = vpop.permute.xlu1 %855  ;;  %903 = vrot.lane.b32.xlu1 %v823_v30, %s1686_s28  ;;  %901 = vrot.lane.b32.xlu0 %v816_v31, %s1686_s28 }
 0x101   : > { %v860_v39 = vmul.f32 %v856_v36, %v1974_v48  ;;  %v861_v40 = vmul.f32 %v856_v36, %v1976_v44  ;;  %v794_v30 = vrot.slane %v793_v26, 1 }
 0x102   : > { %v741_v45 = vadd.f32 %v740_v35, %v739_v29  ;;  %v734_v12 = vadd.f32 %v733_v33, %v732_v19 }
 0x103   : > { %v862_v49 = vadd.f32 %v860_v39, %v858_v37  ;;  %v869_v50 = vadd.f32 %v861_v40, %v859_v38  ;;  %v795_v33 = vadd.f32 %v794_v30, %v793_v26 }
 0x104   : > { %v742_v27 = vrot.slane %v741_v45, 1  ;;  %v735_v51 = vrot.slane %v734_v12, 1 }
 0x105   : > { %v863_v55 = vrot.slane %v862_v49, 4  ;;  %v870_v56 = vrot.slane %v869_v50, 4 }
 0x106   : > { %v743_v58 = vadd.f32 %v742_v27, %v741_v45  ;;  %v736_v59 = vadd.f32 %v735_v51, %v734_v12 }
 0x107   : > { %v864_v41 = vadd.f32 %v863_v55, %v862_v49  ;;  %v871_v2 = vadd.f32 %v870_v56, %v869_v50 }
 0x108   : > { %879 = vrot.lane.b32.xlu0 %v743_v58, %s1686_s28  ;;  %877 = vrot.lane.b32.xlu2 %v736_v59, %s1686_s28  ;;  %s1342_s28 = sld [smem:[#allocation2 + $0x1]] }
 0x109   : > { %v865_v4 = vrot.slane %v864_v41, 2  ;;  %v872_v6 = vrot.slane %v871_v2, 2  ;;  %v826_v10 = vpop.permute.xlu1 %825 }
 0x10a   : > { %v832_v13 = vmul.f32 %v826_v10, %v1978_v46  ;;  %v833_v34 = vmul.f32 %v826_v10, %v1980_v22 }
 0x10b   : > { %v866_v62 = vadd.f32 %v865_v4, %v864_v41  ;;  %v873_v54 = vadd.f32 %v872_v6, %v871_v2 }
 0x10c   : > { %v836_v57 = vadd.f32 %v834_v3, %v832_v13  ;;  %v843_v15 = vadd.f32 %v835_v11, %v833_v34 }
 0x10d   : > { %v867_v16 = vrot.slane %v866_v62, 1  ;;  %v874_v17 = vrot.slane %v873_v54, 1 }
 0x10e   : > { %v844_v35 = vrot.slane %v843_v15, 4  ;;  %v837_v36 = vrot.slane %v836_v57, 4  ;;  %v909_v52 = vstv %s1342_s28  ;;  %s2266_s28 = sshll.u32 %s1669_s16, 3 }
 0x10f   : > { %v868_v24 = vadd.f32 %v867_v16, %v866_v62  ;;  %v875_v25 = vadd.f32 %v874_v17, %v873_v54 }
 0x110   : > { %890 = vrot.lane.b32.xlu0 %v788_v18, %s1685_s20  ;;  %v845_v37 = vadd.f32 %v844_v35, %v843_v15  ;;  %v838_v38 = vadd.f32 %v837_v36, %v836_v57 }
 0x111   : > { %v746_v53 = vpop.permute.xlu1 %745  ;;  %914 = vrot.lane.b32.xlu1 %v868_v24, %s1685_s20  ;;  %916 = vrot.lane.b32.xlu2 %v875_v25, %s1685_s20 }
 0x112   : > { %v752_v19 = vmul.f32 %v746_v53, %v1978_v46  ;;  %v753_v29 = vmul.f32 %v746_v53, %v1980_v22  ;;  %v846_v39 = vrot.slane %v845_v37, 2  ;;  %v839_v40 = vrot.slane %v838_v38, 2 }
 0x114   : > { %v756_v31 = vadd.f32 %v754_v0, %v752_v19  ;;  %v763_v32 = vadd.f32 %v755_v28, %v753_v29  ;;  %v847_v46 = vadd.f32 %v846_v39, %v845_v37  ;;  %v840_v12 = vadd.f32 %v839_v40, %v838_v38 }
 0x116   : > { %v757_v43 = vrot.slane %v756_v31, 4  ;;  %v764_v44 = vrot.slane %v763_v32, 4  ;;  %v848_v51 = vrot.slane %v847_v46, 1  ;;  %v841_v58 = vrot.slane %v840_v12, 1 }
 0x118   : > { %v758_v47 = vadd.f32 %v757_v43, %v756_v31  ;;  %v765_v49 = vadd.f32 %v764_v44, %v763_v32  ;;  %v849_v3 = vadd.f32 %v848_v51, %v847_v46  ;;  %v842_v4 = vadd.f32 %v841_v58, %v840_v12 }
 0x119   : > { %892 = vrot.lane.b32.xlu1 %v795_v33, %s1685_s20  ;;  %s2018_s20 = sld [smem:[#allocation2]] }
 0x11a   : > { %v759_v59 = vrot.slane %v758_v47, 2  ;;  %v766_v61 = vrot.slane %v765_v49, 2 }
 0x11c   : > { %v760_v6 = vadd.f32 %v759_v59, %v758_v47  ;;  %v767_v10 = vadd.f32 %v766_v61, %v765_v49 }
 0x11e   : > { %v768_v26 = vrot.slane %v767_v10, 1  ;;  %v761_v53 = vrot.slane %v760_v6, 1 }
 0x11f   : > { %v885_v14 = vstv %s2018_s20  ;;  %s2094_s20 = scalar_lea.hbm %s2261_s8, %s2266_s28 }
 0x120   : > { %v769_v8 = vadd.f32 %v768_v26, %v767_v10  ;;  %v762_v30 = vadd.f32 %v761_v53, %v760_v6  ;;  %s1085_s28 = sshll.u32 %s2094_s20, 4  ;;  %s1051_s20 = scalar_lea.sflag [#allocation10], %s2055_s12  ;;  %s1086_s28 = int_to_ptr.hbm [resolvable:$true] %s1085_s28 }
 0x162   : > { %v878_v22 = vpop.permute.xlu2 %877 }
 0x16b   : > { %v917_v34 = vpop.permute.xlu2 %916 }
 0x172   : > { %v902_v48 = vpop.permute.xlu0 %901  ;;  %v904_v45 = vpop.permute.xlu1 %903 }
 0x173   : > { %v905_v50 = vsel %vm558_vm1, %v902_v48, %v904_v45  ;;  %v906_v27 = vsel %vm558_vm1, %v904_v45, %v902_v48 }
 0x174   : > { %v907_v55 = vsel %vm1911_vm2, %v906_v27, 0.0  ;;  %v908_v56 = vsel %vm1915_vm3, %v905_v50, 0.0 }
 0x175   : > { %v910_v41 = vadd.f32 %v909_v52, %v907_v55  ;;  %v911_v2 = vadd.f32 %v909_v52, %v908_v56 }
 0x177   : > { %v912_v62 = vadd.f32 %v910_v41, %v842_v4  ;;  %v913_v54 = vadd.f32 %v911_v2, %v849_v3 }
 0x17a   : > { %v880_v1 = vpop.permute.xlu0 %879 }
 0x17b   : > { %v881_v11 = vsel %vm558_vm1, %v878_v22, %v880_v1  ;;  %v882_v13 = vsel %vm558_vm1, %v880_v1, %v878_v22  ;;  %vm2099_vm1 = vcmp.lt.s32.totalorder %v523_v60, 256 }
 0x17c   : > { %v883_v16 = vsel %vm1911_vm2, %v882_v13, 0.0  ;;  %v884_v17 = vsel %vm1915_vm3, %v881_v11, 0.0 }
 0x17d   : > { %v886_v0 = vadd.f32 %v885_v14, %v883_v16  ;;  %v887_v28 = vadd.f32 %v885_v14, %v884_v17 }
 0x17f   : > { %v888_v32 = vadd.f32 %v886_v0, %v762_v30  ;;  %v889_v33 = vadd.f32 %v887_v28, %v769_v8 }
 0x182   : > { %v891_v31 = vpop.permute.xlu0 %890 }
 0x183   : > { %v915_v42 = vpop.permute.xlu1 %914 }
 0x184   : > { %v918_v57 = vsel %vm567_vm4, %v915_v42, %v917_v34  ;;  %v919_v15 = vsel %vm567_vm4, %v917_v34, %v915_v42 }
 0x185   : > { %v920_v18 = vsel %vm1930_vm5, %v918_v57, 0.0  ;;  %v921_v23 = vsel %vm1934_vm6, %v919_v15, 0.0 }
 0x186   : > { %v922_v24 = vadd.f32 %v920_v18, %v912_v62  ;;  %v923_v25 = vadd.f32 %v921_v23, %v913_v54 }
 0x188   : > { %v1345_v19 = vmul.f32 -1.442695, %v922_v24  ;;  %v1346_v29 = vmul.f32 -1.442695, %v923_v25 }
 0x18a   : > { %1472 = vpow2.f32 %v1345_v19 }
 0x18b   : > { %1474 = vpow2.f32 %v1346_v29  ;;  %v893_v9 = vpop.permute.xlu1 %892 }
 0x18c   : > { %v894_v35 = vsel %vm567_vm4, %v891_v31, %v893_v9  ;;  %v895_v36 = vsel %vm567_vm4, %v893_v9, %v891_v31 }
 0x18d   : > { %v896_v37 = vsel %vm1930_vm5, %v894_v35, 0.0  ;;  %v897_v38 = vsel %vm1934_vm6, %v895_v36, 0.0 }
 0x18e   : > { %v898_v39 = vadd.f32 %v896_v37, %v888_v32  ;;  %v899_v40 = vadd.f32 %v897_v38, %v889_v33 }
 0x190   : > { %v1473_v48 = vpop.eup %1472  ;;  %v1343_v43 = vmul.f32 -1.442695, %v898_v39  ;;  %v1344_v46 = vmul.f32 -1.442695, %v899_v40 }
 0x191   : > { %v1475_v44 = vpop.eup %1474  ;;  %v968_v45 = vadd.f32 1.0, %v1473_v48 }
 0x192   : > { %v969_v12 = vadd.f32 1.0, %v1475_v44  ;;  %1476 = vpow2.f32 %v1343_v43 }
 0x193   : > { %1478 = vrcp.f32 %v968_v45  ;;  %v981_v55 = vand.u32 2147483648, %v968_v45  ;;  %v979_v59 = vand.u32 2147483647, %v968_v45  ;;  %vm975_vm9 = vweird.f32 %v968_v45 }
 0x194   : > { %1480 = vrcp.f32 %v969_v12  ;;  %v996_v58 = vand.u32 2147483648, %v969_v12  ;;  %v994_v1 = vand.u32 2147483647, %v969_v12  ;;  %vm990_vm11 = vweird.f32 %v969_v12 }
 0x195   : > { %1482 = vpow2.f32 %v1344_v46  ;;  %v982_v11 = vor.u32 1.1754944e-38, %v981_v55  ;;  %vm980_vm13 = vcmp.eq.f32.partialorder %v979_v59, 8.507059e+37 }
 0x196   : > { %v997_v13 = vor.u32 1.1754944e-38, %v996_v58  ;;  %vm995_vm14 = vcmp.eq.f32.partialorder %v994_v1, 8.507059e+37 }
 0x198   : > { %v1477_v63 = vpop.eup %1476 }
 0x199   : > { %v1479_v20 = vpop.eup %1478  ;;  %v2049_v22 = vadd.f32 1.0, %v1477_v63 }
 0x19a   : > { %v1481_v21 = vpop.eup %1480  ;;  %v971_v47 = vmul.f32 %v1479_v20, %v968_v45  ;;  %vm976_vm7 = vweird.f32 %v1479_v20 }
 0x19b   : > { %v1483_v49 = vpop.eup %1482  ;;  %v986_v50 = vmul.f32 %v1481_v21, %v969_v12  ;;  %1484 = vrcp.f32 %v2049_v22  ;;  %vm991_vm8 = vweird.f32 %v1481_v21  ;;  %vm2070_vm10 = vmor %vm975_vm9, %vm976_vm7  ;;  %vm937_vm2 = vweird.f32 %v2049_v22 }
 0x19c   : > { %v972_v27 = vsub.f32 1.0, %v971_v47  ;;  %v2052_v51 = vadd.f32 1.0, %v1483_v49  ;;  %vm992_vm12 = vmor %vm990_vm11, %vm991_vm8  ;;  %v941_v53 = vand.u32 2147483647, %v2049_v22  ;;  %v943_v0 = vand.u32 2147483648, %v2049_v22 }
 0x19d   : > { %v987_v52 = vsub.f32 1.0, %v986_v50 }
 0x19e   : > { %1486 = vrcp.f32 %v2052_v51  ;;  %v973_v56 = vmul.f32 %v1479_v20, %v972_v27  ;;  %v958_v28 = vand.u32 2147483648, %v2052_v51  ;;  %v956_v8 = vand.u32 2147483647, %v2052_v51 }
 0x19f   : > { %v988_v61 = vmul.f32 %v1481_v21, %v987_v52 }
 0x1a0   : > { %v974_v41 = vadd.f32 %v1479_v20, %v973_v56 }
 0x1a1   : > { %v2067_v2 = vpop.eup %1484  ;;  %v989_v4 = vadd.f32 %v1481_v21, %v988_v61 }
 0x1a2   : > { %v933_v6 = vmul.f32 %v2067_v2, %v2049_v22  ;;  %v978_v10 = vsel %vm2070_vm10, %v1479_v20, %v974_v41  ;;  %vm938_vm3 = vweird.f32 %v2067_v2 }
 0x1a3   : > { %v993_v34 = vsel %vm992_vm12, %v1481_v21, %v989_v4  ;;  %v983_v62 = vsel %vm980_vm13, %v982_v11, %v978_v10 }
 0x1a4   : > { %v2087_v14 = vpop.eup %1486  ;;  %v934_v42 = vsub.f32 1.0, %v933_v6  ;;  %v998_v54 = vsel %vm995_vm14, %v997_v13, %v993_v34  ;;  %v1026_v24 = vperm.slane %v983_v62, 0 }
 0x1a5   : > { %v948_v57 = vmul.f32 %v2087_v14, %v2052_v51  ;;  %v1027_v15 = vperm.slane %v998_v54, 0  ;;  %v1013_v17 = vrot.slane %v998_v54, 7  ;;  %vm953_vm4 = vweird.f32 %v2087_v14 }
 0x1a6   : > { %v935_v18 = vmul.f32 %v2067_v2, %v934_v42 }
 0x1a7   : > { %v949_v23 = vsub.f32 1.0, %v948_v57  ;;  %v1030_v60 = vrot.slane %v1027_v15, 4  ;;  %v1014_v25 = vsel %vm1003_vm15, %v983_v62, %v1013_v17 }
 0x1a8   : > { %v936_v26 = vadd.f32 %v2067_v2, %v935_v18  ;;  %1016 = vst.msk [vmem:[%s2083_s27] sm:$0x3] %vm2099_vm1, %v1014_v25 }
 0x1a9   : > { %v1031_v19 = vsel %vm484_vm0, %v1026_v24, %v1030_v60  ;;  %v950_v29 = vmul.f32 %v2087_v14, %v949_v23 }
 0x1aa   : > { %1530 = shalt.err (!%p1527_p9)
}
 0x1ab   : > { %1370 = dma.vmem_to_hbm [thread:$0]  (%p1786_p4), %s2106_s29, 32, %s2108_s22, %s1051_s20   ;;  %v1033_v30 = vmul.f32 %v1031_v19, %v1836_v7  ;;  %vm2154_vm5 = vmor %vm937_vm2, %vm938_vm3  ;;  %v951_v32 = vadd.f32 %v2087_v14, %v950_v29  ;;  %vm952_vm6 = vweird.f32 %v2052_v51  ;;  %v944_v7 = vor.u32 1.1754944e-38, %v943_v0 }
 0x1ac   : > { %v940_v9 = vsel %vm2154_vm5, %v2067_v2, %v936_v26  ;;  %vm2166_vm7 = vmor %vm952_vm6, %vm953_vm4  ;;  %v959_v35 = vor.u32 1.1754944e-38, %v958_v28  ;;  %s2302_s3 = sshll.u32 %s2055_s12, 1  ;;  %s1101_s22 = sshll.u32 %s2126_s0, 4  ;;  %s1102_s22 = int_to_ptr.hbm [resolvable:$true] %s1101_s22 }
 0x1ad   : > { %1034 = vst [vmem:[%s2112_s30] sm:$0xff] %v1033_v30  ;;  %s2172_s4 = scalar_lea.vmem [#allocation8], %s2302_s3  ;;  %s2303_s29 = sand.u32 1, %s1774_s19  }
 0x1ae   : > { %s1099_s5 = sshll.u32 %s2172_s4, 4  ;;  %s2178_s20 = scalar_lea.sflag [#allocation7], %s2303_s29  ;;  %s1100_s5 = int_to_ptr.vmem [resolvable:$true] %s1099_s5 }
 0x1af   : > { %s1545_s1 = sshra.s32 %s1086_s28, 4  ;;  %s1551_s27 = scalar_lea.hbm %s2261_s8, 16  ;;  %s1546_s1 = int_to_ptr.hbm [resolvable:$true] %s1545_s1 }
 0x1b0   : > { %s1547_s30 = scalar_lea.hbm %s1546_s1, 8  ;;  %p1552_p13 = scmp.lt.s32.totalorder %s1546_s1, %s2261_s8 }
 0x1b1   : > { %p1548_p10 = scmp.ne.s32.totalorder %s1546_s1, %s1547_s30  ;;  %p1553_p0 = scmp.lt.s32.totalorder %s1551_s27, %s1547_s30 }
 0x1b3   : > { %p1549_p11 = pnand %p1548_p10, %p1786_p4  ;;  %p1554_p1 = por %p1553_p0, %p1552_p13 }
 0x1b5   : > { %p1550_p12 = pneg %p1549_p11 }
 0x1b7   : > { %p1555_p2 = pnand %p1554_p1, %p1550_p12 }
 0x1b9   : > { %1558 = shalt.err (!%p1555_p2)
}
 0x1ba   : > { %1368 = dma.vmem_to_hbm [thread:$0]  (%p1786_p4), %s1084_s11, 128, %s1086_s28, %s2178_s20   ;;  %vm942_vm8 = vcmp.eq.f32.partialorder %v941_v53, 8.507059e+37  ;;  %v955_v36 = vsel %vm2166_vm7, %v2087_v14, %v951_v32  ;;  %vm957_vm9 = vcmp.eq.f32.partialorder %v956_v8, 8.507059e+37 }
 0x1bb   : > { %v945_v37 = vsel %vm942_vm8, %v944_v7, %v940_v9  ;;  %v960_v38 = vsel %vm957_vm9, %v959_v35, %v955_v36  ;;  %s2304_s6 = sshll.u32 %s1669_s16, 3  ;;  %s2305_s28 = sshll.u32 %s2055_s12, 3 }
 0x1bc   : > { %s1064_s29 = scalar_lea.hbm %s2260_s7, %s2304_s6  ;;  %v1018_v39 = vperm.slane %v960_v38, 0  ;;  %v1002_v40 = vrot.slane %v960_v38, 7  ;;  %v1017_v48 = vperm.slane %v945_v37, 0  ;;  %s430_s11 = scalar_lea.vmem [#allocation5], %s2305_s28 }
 0x1bd   : > { %s1066_s1 = sshll.u32 %s430_s11, 4  ;;  %s1068_s30 = sshll.u32 %s1064_s29, 4  ;;  %s1067_s1 = int_to_ptr.vmem [resolvable:$true] %s1066_s1  ;;  %s1069_s30 = int_to_ptr.hbm [resolvable:$true] %s1068_s30 }
 0x1be   : > { %v1021_v43 = vrot.slane %v1018_v39, 4  ;;  %v1004_v44 = vsel %vm1003_vm15, %v945_v37, %v1002_v40  ;;  %s1573_s16 = sshra.s32 %s1102_s22, 4  ;;  %s1579_s3 = scalar_lea.hbm %s2262_s9, 4  ;;  %s1574_s16 = int_to_ptr.hbm [resolvable:$true] %s1573_s16 }
 0x1bf   : > { %1010 = vst.msk [vmem:[%s2172_s4] sm:$0x3] %vm2099_vm1, %v1004_v44  ;;  %s1575_s2 = scalar_lea.hbm %s1574_s16, 2  ;;  %p1580_p7 = scmp.lt.s32.totalorder %s1574_s16, %s2262_s9 }
 0x1c0   : > { %v1022_v45 = vsel %vm484_vm0, %v1017_v48, %v1021_v43  ;;  %p1576_p3 = scmp.ne.s32.totalorder %s1574_s16, %s1575_s2  ;;  %p1581_p9 = scmp.lt.s32.totalorder %s1579_s3, %s1575_s2 }
 0x1c2   : > { %p1577_p5 = pnand %p1576_p3, %p1786_p4  ;;  %p1582_p10 = por %p1581_p9, %p1580_p7 }
 0x1c4   : > { %p1578_p6 = pneg %p1577_p5 }
 0x1c6   : > { %p1583_p11 = pnand %p1582_p10, %p1578_p6 }
 0x1c8   : > { %1586 = shalt.err (!%p1583_p11)
}
 0x1c9   : > { %1369 = dma.vmem_to_hbm [thread:$0]  (%p1786_p4), %s1100_s5, 32, %s1102_s22, %s2178_s20   ;;  %v1024_v46 = vmul.f32 %v1022_v45, %v1828_v5 }
 0x1ca   : > { %s1036_s4 = scalar_lea.sflag [#allocation3], %s2055_s12  ;;  %s1601_s0 = sshra.s32 %s1069_s30, 4  ;;  %s1602_s0 = int_to_ptr.hbm [resolvable:$true] %s1601_s0 }
 0x1cb   : > { %1025 = vst [vmem:[%s430_s11] sm:$0xff] %v1024_v46  ;;  %s1603_s29 = scalar_lea.hbm %s1602_s0, 8  ;;  %s1607_s2 = scalar_lea.hbm %s2260_s7, 16 }
 0x1cc   : > { %p1604_p12 = scmp.ne.s32.totalorder %s1602_s0, %s1603_s29  ;;  %p1608_p1 = scmp.lt.s32.totalorder %s1602_s0, %s2260_s7 }
 0x1cd   : > { %p1609_p2 = scmp.lt.s32.totalorder %s1607_s2, %s1603_s29 }
 0x1ce   : > { %p1605_p13 = pnand %p1604_p12, %p1786_p4 }
 0x1cf   : > { %p1610_p3 = por %p1609_p2, %p1608_p1 }
 0x1d0   : > { %p1606_p0 = pneg %p1605_p13 }
 0x1d2   : > { %p1611_p5 = pnand %p1610_p3, %p1606_p0 }
 0x1d4   : > { %1614 = shalt.err (!%p1611_p5)
}
 0x1d5   : > { %1367 = dma.vmem_to_hbm [thread:$0]  (%p1786_p4), %s1067_s1, 128, %s1069_s30, %s1036_s4  }
 0x1d6 PF: > { %p1394_p6 = scmp.ge.s32.totalorder %s1677_s18, 2  ;;  %s1129_s12 = sand.u32 1, %s1657_s13  }
 0x1d7   : > { %s1130_s5 = scalar_lea.sflag [#allocation3], %s1129_s12 }
 0x1d8   : > { %p1380_p7 = pnand %p1394_p6, %p1795_p8 }
 0x1da   : > { %p1381_p9 = pneg %p1380_p7 }
 0x1dc   : > { %1644 = dma.done.wait (%p1381_p9), %s1130_s5, 128  }
 0x1dd   : > { %1646 = vsyncadd (%p1381_p9), %s1130_s5, 4294967168  ;;  %s2306_s22 = sadd.s32 4294967294, %s1677_s18  }
 0x1de   : > { %s1139_s20 = sand.u32 1, %s2306_s22  }
 0x1df   : > { %s1140_s11 = scalar_lea.sflag [#allocation7], %s1139_s20 }
 0x1e0   : > { %1648 = dma.done.wait (%p1381_p9), %s1140_s11, 160  }
 0x1e1   : > { %1650 = vsyncadd (%p1381_p9), %s1140_s11, 4294967136  ;;  %s1160_s23 = scalar_lea.sflag [#allocation10], %s1129_s12 }
 0x1e2   : > { %1652 = dma.done.wait (%p1381_p9), %s1160_s23, 32  }
 0x1e3   : > { %1654 = vsyncadd (%p1381_p9), %s1160_s23, 4294967264  ;;  %s31_s18 = sadd.s32 1, %s1677_s18   ;;  %s2307_s13 = smov %s1661_s14 }
 0x1e4   : > { %p28_p4 = scmp.ge.s32.totalorder %s31_s18, 4   ;;  %s2308_s14 = smov %s1665_s15 }
 0x1e5   : > { %s2309_s15 = smov %s1801_s26  ;;  %s2310_s16 = smov %s1673_s17 }
 0x1e6   : > { %s2311_s17 = smov %s2313_s21  ;;  %30 = sbr.rel (!%p28_p4) target bundleno = 17 (0x11), region = 140 }
 0x1eb   :  { %1166 = vsyncpa [#allocation3], 1 }
 0x1ec   :  { %1168 = vsyncpa [#allocation3 + $0x1], 1 }
 0x1ed   :  { %1169 = vsyncpa [#allocation7], 1 }
 0x1ee   :  { %1171 = vsyncpa [#allocation7 + $0x1], 1 }
 0x1ef   :  { %1172 = vsyncpa [#allocation10], 1 }
 0x1f0   :  { %1174 = vsyncpa [#allocation10 + $0x1], 1 }
 0x1f1   :  { %1175 = vsyncpa [#allocation4], 1 }
 0x1f2   :  { %1177 = vsyncpa [#allocation4 + $0x1], 1 }

</bundles_post_ra>
